<compile_context>
chip_gen: v5e
topology: v5e:2x2
jax: 0.10.0
libtpu: 0.0.40
codegen_flags: <defaults>
</compile_context>

<pallas_src>
import jax
import jax.numpy as jnp
from jax.experimental import pallas as pl
from jax.experimental.pallas import tpu as pltpu


def _round_up(x: int, m: int) -> int:
    return ((x + m - 1) // m) * m


def _make_corr_kernel(num_layers: int, compute_dtype):
    """Kernel body: fused split-W0 MLP on both symmetric halves of a batch tile."""

    def kernel(x1_ref, x2_ref, *refs):
        out_ref = refs[-1]
        w = refs[:-1]

        x1 = x1_ref[...]
        x2 = x2_ref[...]

        # Layer 0.  FF(cat([x1,x2],1)) == x1@W0a + x2@W0b (+b0) with W0 split
        # into its top/bottom Din row blocks, so the concat is never built.
        w0a = w[0][...]
        w0b = w[1][...]
        b0 = w[2][...]                                         # [1, H], f32
        h_top = (jnp.dot(x1, w0a, preferred_element_type=jnp.float32)
                 + jnp.dot(x2, w0b, preferred_element_type=jnp.float32) + b0)
        h_bot = (jnp.dot(x2, w0a, preferred_element_type=jnp.float32)
                 + jnp.dot(x1, w0b, preferred_element_type=jnp.float32) + b0)
        h_top = jnp.maximum(h_top, 0.0)
        h_bot = jnp.maximum(h_bot, 0.0)

        idx = 3
        for _ in range(1, num_layers):
            wl = w[idx][...]
            bl = w[idx + 1][...]
            idx += 2
            h_top = jnp.maximum(
                jnp.dot(h_top.astype(compute_dtype), wl,
                        preferred_element_type=jnp.float32) + bl, 0.0)
            h_bot = jnp.maximum(
                jnp.dot(h_bot.astype(compute_dtype), wl,
                        preferred_element_type=jnp.float32) + bl, 0.0)

        w_out = w[idx][...]
        b_out = w[idx + 1][...]
        y_top = jnp.dot(h_top.astype(compute_dtype), w_out,
                        preferred_element_type=jnp.float32) + b_out
        y_bot = jnp.dot(h_bot.astype(compute_dtype), w_out,
                        preferred_element_type=jnp.float32) + b_out

        corr = (y_top + y_bot) * 0.5
        # 2*sigmoid(x) - 1 == tanh(x/2): one EUP op, no extra VPU passes.
        out_ref[...] = (1.0 - 1e-8) * jnp.tanh(0.5 * corr)

    return kernel


def corr_encoder_forward(x1, x2, params, dim_output, *,
                         compute_dtype=jnp.bfloat16, tile_b=512):
    """params: list of (W[in,out], b[out]) pairs: num_layers hidden + 1 output."""
    assert x1.shape == x2.shape and x1.ndim == 2
    B, Din = x1.shape
    num_layers = len(params) - 1
    assert num_layers >= 1

    # ---- batch tiling: TB multiple of 8 sublanes; grid pipelines the tiles.
    tb = min(int(tile_b), _round_up(B, 8))
    tb = _round_up(tb, 8)
    Bp = _round_up(B, tb)
    if Bp != B:
        pad = Bp - B
        x1 = jnp.pad(x1, ((0, pad), (0, 0)))
        x2 = jnp.pad(x2, ((0, pad), (0, 0)))
    x1 = x1.astype(compute_dtype)
    x2 = x2.astype(compute_dtype)

    # ---- lane-dense output: pad Dout to a multiple of 128, slice back below.
    dout_p = _round_up(dim_output, 128)

    # ---- flatten / cast parameters; split W0 (concat elimination).
    w0, b0 = params[0]
    assert w0.shape[0] == 2 * Din
    flat = [
        w0[:Din].astype(compute_dtype),                       # W0a [Din, H]
        w0[Din:].astype(compute_dtype),                       # W0b [Din, H]
        b0.reshape(1, -1).astype(jnp.float32),
    ]
    for (w, b) in params[1:-1]:
        flat.append(w.astype(compute_dtype))
        flat.append(b.reshape(1, -1).astype(jnp.float32))
    w_out, b_out = params[-1]
    dh = w_out.shape[0]
    w_out_p = jnp.zeros((dh, dout_p), compute_dtype).at[:, :dim_output].set(
        w_out.astype(compute_dtype))
    b_out_p = jnp.zeros((1, dout_p), jnp.float32).at[:, :dim_output].set(
        b_out.reshape(1, -1).astype(jnp.float32))
    flat += [w_out_p, b_out_p]

    grid = (Bp // tb,)
    x_spec = pl.BlockSpec((tb, Din), lambda i: (i, 0))
    # Weights/biases: full-array blocks at a fixed index -> VMEM-resident.
    w_specs = [pl.BlockSpec(p.shape, lambda i: (0, 0)) for p in flat]
    out_spec = pl.BlockSpec((tb, dout_p), lambda i: (i, 0))

    # Rough VMEM budget: resident params + double-buffered in/out tiles (+2x headroom).
    param_bytes = sum(int(p.size) * p.dtype.itemsize for p in flat)
    tile_bytes = 2 * (2 * tb * Din * jnp.dtype(compute_dtype).itemsize
                      + tb * dout_p * 4)
    vmem_limit = int(min(64 * 1024 * 1024,
                         max(32 * 1024 * 1024, 2 * (param_bytes + tile_bytes))))

    kernel = _make_corr_kernel(num_layers, compute_dtype)
    out = pl.pallas_call(
        kernel,
        grid=grid,
        in_specs=[x_spec, x_spec] + w_specs,
        out_specs=out_spec,
        out_shape=jax.ShapeDtypeStruct((Bp, dout_p), jnp.float32),
        compiler_params=pltpu.CompilerParams(
            dimension_semantics=("parallel",),
            vmem_limit_bytes=vmem_limit,
        ),
    )(x1, x2, *flat)
    return out[:B, :dim_output]


def _init_ff_params(key, dim_input, dim_hidden, dim_output, num_layers):
    """Deterministic FF parameter init (PyTorch-Linear-style uniform), W as [in,out]."""
    params = []
    d_in = dim_input
    for _ in range(num_layers):
        key, kw, kb = jax.random.split(key, 3)
        bound = 1.0 / jnp.sqrt(d_in)
        w = jax.random.uniform(kw, (d_in, dim_hidden), jnp.float32, -bound, bound)
        b = jax.random.uniform(kb, (dim_hidden,), jnp.float32, -bound, bound)
        params.append((w, b))
        d_in = dim_hidden
    key, kw, kb = jax.random.split(key, 3)
    bound = 1.0 / jnp.sqrt(d_in)
    w = jax.random.uniform(kw, (d_in, dim_output), jnp.float32, -bound, bound)
    b = jax.random.uniform(kb, (dim_output,), jnp.float32, -bound, bound)
    params.append((w, b))
    return params


def _reference_forward(x1, x2, params, dim_output):
    """Pure-JAX f32 reference matching the PyTorch module semantics."""
    net = jnp.concatenate(
        [jnp.concatenate([x1, x2], axis=1), jnp.concatenate([x2, x1], axis=1)],
        axis=0,
    )
    h = net
    for (w, b) in params[:-1]:
        h = jax.nn.relu(h @ w + b)
    w, b = params[-1]
    y = h @ w + b
    y = y.reshape(2, -1, dim_output)
    corr = (y[0] + y[1]) / 2.0
    return (1.0 - 1e-8) * (2.0 * jax.nn.sigmoid(corr) - 1.0)


if __name__ == "__main__":
    batch = 8
    dim_input = 16      # x1 / x2 feature dim; FF input is 2*dim_input = 32
    dim_hidden = 32
    dim_output = 16
    num_layers = 2

    key = jax.random.PRNGKey(0)
    k1, k2, kp = jax.random.split(key, 3)
    x1 = jax.random.normal(k1, (batch, dim_input), jnp.float32)
    x2 = jax.random.normal(k2, (batch, dim_input), jnp.float32)
    params = _init_ff_params(kp, 2 * dim_input, dim_hidden, dim_output, num_layers)

    ref = _reference_forward(x1, x2, params, dim_output)

    # f32 path: tight check against the pure-JAX reference.
    out_f32 = jax.block_until_ready(
        corr_encoder_forward(x1, x2, params, dim_output, compute_dtype=jnp.float32))
    assert out_f32.shape == (batch, dim_output)
    assert jnp.allclose(out_f32, ref, atol=1e-5, rtol=1e-5), "f32 mismatch vs reference"

    # bf16 path (default; MXU-friendly operands, f32 accumulation/epilogue).
    out_bf16 = jax.block_until_ready(
        corr_encoder_forward(x1, x2, params, dim_output))
    assert out_bf16.shape == (batch, dim_output)
    assert jnp.allclose(out_bf16, ref, atol=5e-2, rtol=5e-2), "bf16 mismatch vs reference"

    print("KERNEL_OK")
</pallas_src>

<mosaic_0001>
module attributes {stable_mosaic.version = 11 : i64} {
  func.func @kernel(%arg0: i32, %arg1: memref<8x16xf32, #tpu.memory_space<vmem>>, %arg2: memref<8x16xf32, #tpu.memory_space<vmem>>, %arg3: memref<16x32xf32, #tpu.memory_space<vmem>>, %arg4: memref<16x32xf32, #tpu.memory_space<vmem>>, %arg5: memref<1x32xf32, #tpu.memory_space<vmem>>, %arg6: memref<32x32xf32, #tpu.memory_space<vmem>>, %arg7: memref<1x32xf32, #tpu.memory_space<vmem>>, %arg8: memref<32x128xf32, #tpu.memory_space<vmem>>, %arg9: memref<1x128xf32, #tpu.memory_space<vmem>>, %arg10: memref<8x128xf32, #tpu.memory_space<vmem>>) attributes {dimension_semantics = [#tpu.dimension_semantics<parallel>], iteration_bounds = array<i64: 1>, scalar_prefetch = 0 : i64, scratch_operands = 0 : i64, tpu.core_type = #tpu.core_type<tc>, window_params = [{transform_indices = @transform_0, window_bounds = array<i64: 8, 16>}, {transform_indices = @transform_1, window_bounds = array<i64: 8, 16>}, {pipeline_mode = #tpu.pipeline_mode<synchronous>, transform_indices = @transform_2, window_bounds = array<i64: 16, 32>}, {pipeline_mode = #tpu.pipeline_mode<synchronous>, transform_indices = @transform_3, window_bounds = array<i64: 16, 32>}, {pipeline_mode = #tpu.pipeline_mode<synchronous>, transform_indices = @transform_4, window_bounds = array<i64: 1, 32>}, {pipeline_mode = #tpu.pipeline_mode<synchronous>, transform_indices = @transform_5, window_bounds = array<i64: 32, 32>}, {pipeline_mode = #tpu.pipeline_mode<synchronous>, transform_indices = @transform_6, window_bounds = array<i64: 1, 32>}, {pipeline_mode = #tpu.pipeline_mode<synchronous>, transform_indices = @transform_7, window_bounds = array<i64: 32, 128>}, {pipeline_mode = #tpu.pipeline_mode<synchronous>, transform_indices = @transform_8, window_bounds = array<i64: 1, 128>}, {transform_indices = @transform_9, window_bounds = array<i64: 8, 128>}]} {
    %c0 = arith.constant 0 : index
    %c0_0 = arith.constant 0 : index
    %0 = vector.load %arg1[%c0, %c0_0] : memref<8x16xf32, #tpu.memory_space<vmem>>, vector<8x16xf32>
    %c0_1 = arith.constant 0 : index
    %c0_2 = arith.constant 0 : index
    %1 = vector.load %arg2[%c0_1, %c0_2] : memref<8x16xf32, #tpu.memory_space<vmem>>, vector<8x16xf32>
    %c0_3 = arith.constant 0 : index
    %c0_4 = arith.constant 0 : index
    %2 = vector.load %arg3[%c0_3, %c0_4] : memref<16x32xf32, #tpu.memory_space<vmem>>, vector<16x32xf32>
    %c0_5 = arith.constant 0 : index
    %c0_6 = arith.constant 0 : index
    %3 = vector.load %arg4[%c0_5, %c0_6] : memref<16x32xf32, #tpu.memory_space<vmem>>, vector<16x32xf32>
    %c0_7 = arith.constant 0 : index
    %c0_8 = arith.constant 0 : index
    %4 = vector.load %arg5[%c0_7, %c0_8] : memref<1x32xf32, #tpu.memory_space<vmem>>, vector<1x32xf32>
    %cst = arith.constant dense<0.000000e+00> : vector<8x32xf32>
    %5 = tpu.matmul %0, %2, %cst {dimension_numbers = #tpu.dot_dimension_numbers<[1], [0], [0], [1], [0, 0, 1, 1], [], []>} : vector<8x16xf32>, vector<16x32xf32>, vector<8x32xf32> -> vector<8x32xf32>
    %cst_9 = arith.constant dense<0.000000e+00> : vector<8x32xf32>
    %6 = tpu.matmul %1, %3, %cst_9 {dimension_numbers = #tpu.dot_dimension_numbers<[1], [0], [0], [1], [0, 0, 1, 1], [], []>} : vector<8x16xf32>, vector<16x32xf32>, vector<8x32xf32> -> vector<8x32xf32>
    %7 = arith.addf %5, %6 : vector<8x32xf32>
    %8 = vector.broadcast %4 : vector<1x32xf32> to vector<8x32xf32>
    %9 = arith.addf %7, %8 : vector<8x32xf32>
    %cst_10 = arith.constant dense<0.000000e+00> : vector<8x32xf32>
    %10 = tpu.matmul %1, %2, %cst_10 {dimension_numbers = #tpu.dot_dimension_numbers<[1], [0], [0], [1], [0, 0, 1, 1], [], []>} : vector<8x16xf32>, vector<16x32xf32>, vector<8x32xf32> -> vector<8x32xf32>
    %cst_11 = arith.constant dense<0.000000e+00> : vector<8x32xf32>
    %11 = tpu.matmul %0, %3, %cst_11 {dimension_numbers = #tpu.dot_dimension_numbers<[1], [0], [0], [1], [0, 0, 1, 1], [], []>} : vector<8x16xf32>, vector<16x32xf32>, vector<8x32xf32> -> vector<8x32xf32>
    %12 = arith.addf %10, %11 : vector<8x32xf32>
    %13 = vector.broadcast %4 : vector<1x32xf32> to vector<8x32xf32>
    %14 = arith.addf %12, %13 : vector<8x32xf32>
    %cst_12 = arith.constant 0.000000e+00 : f32
    %15 = vector.broadcast %cst_12 : f32 to vector<8x32xf32>
    %16 = arith.maximumf %9, %15 : vector<8x32xf32>
    %cst_13 = arith.constant 0.000000e+00 : f32
    %17 = vector.broadcast %cst_13 : f32 to vector<8x32xf32>
    %18 = arith.maximumf %14, %17 : vector<8x32xf32>
    %c0_14 = arith.constant 0 : index
    %c0_15 = arith.constant 0 : index
    %19 = vector.load %arg6[%c0_14, %c0_15] : memref<32x32xf32, #tpu.memory_space<vmem>>, vector<32x32xf32>
    %c0_16 = arith.constant 0 : index
    %c0_17 = arith.constant 0 : index
    %20 = vector.load %arg7[%c0_16, %c0_17] : memref<1x32xf32, #tpu.memory_space<vmem>>, vector<1x32xf32>
    %cst_18 = arith.constant dense<0.000000e+00> : vector<8x32xf32>
    %21 = tpu.matmul %16, %19, %cst_18 {dimension_numbers = #tpu.dot_dimension_numbers<[1], [0], [0], [1], [0, 0, 1, 1], [], []>} : vector<8x32xf32>, vector<32x32xf32>, vector<8x32xf32> -> vector<8x32xf32>
    %22 = vector.broadcast %20 : vector<1x32xf32> to vector<8x32xf32>
    %23 = arith.addf %21, %22 : vector<8x32xf32>
    %cst_19 = arith.constant 0.000000e+00 : f32
    %24 = vector.broadcast %cst_19 : f32 to vector<8x32xf32>
    %25 = arith.maximumf %23, %24 : vector<8x32xf32>
    %cst_20 = arith.constant dense<0.000000e+00> : vector<8x32xf32>
    %26 = tpu.matmul %18, %19, %cst_20 {dimension_numbers = #tpu.dot_dimension_numbers<[1], [0], [0], [1], [0, 0, 1, 1], [], []>} : vector<8x32xf32>, vector<32x32xf32>, vector<8x32xf32> -> vector<8x32xf32>
    %27 = vector.broadcast %20 : vector<1x32xf32> to vector<8x32xf32>
    %28 = arith.addf %26, %27 : vector<8x32xf32>
    %cst_21 = arith.constant 0.000000e+00 : f32
    %29 = vector.broadcast %cst_21 : f32 to vector<8x32xf32>
    %30 = arith.maximumf %28, %29 : vector<8x32xf32>
    %c0_22 = arith.constant 0 : index
    %c0_23 = arith.constant 0 : index
    %31 = vector.load %arg8[%c0_22, %c0_23] : memref<32x128xf32, #tpu.memory_space<vmem>>, vector<32x128xf32>
    %c0_24 = arith.constant 0 : index
    %c0_25 = arith.constant 0 : index
    %32 = vector.load %arg9[%c0_24, %c0_25] : memref<1x128xf32, #tpu.memory_space<vmem>>, vector<1x128xf32>
    %cst_26 = arith.constant dense<0.000000e+00> : vector<8x128xf32>
    %33 = tpu.matmul %25, %31, %cst_26 {dimension_numbers = #tpu.dot_dimension_numbers<[1], [0], [0], [1], [0, 0, 1, 1], [], []>} : vector<8x32xf32>, vector<32x128xf32>, vector<8x128xf32> -> vector<8x128xf32>
    %34 = vector.broadcast %32 : vector<1x128xf32> to vector<8x128xf32>
    %35 = arith.addf %33, %34 : vector<8x128xf32>
    %cst_27 = arith.constant dense<0.000000e+00> : vector<8x128xf32>
    %36 = tpu.matmul %30, %31, %cst_27 {dimension_numbers = #tpu.dot_dimension_numbers<[1], [0], [0], [1], [0, 0, 1, 1], [], []>} : vector<8x32xf32>, vector<32x128xf32>, vector<8x128xf32> -> vector<8x128xf32>
    %37 = vector.broadcast %32 : vector<1x128xf32> to vector<8x128xf32>
    %38 = arith.addf %36, %37 : vector<8x128xf32>
    %39 = arith.addf %35, %38 : vector<8x128xf32>
    %cst_28 = arith.constant 5.000000e-01 : f32
    %40 = vector.broadcast %cst_28 : f32 to vector<8x128xf32>
    %41 = arith.mulf %39, %40 : vector<8x128xf32>
    %cst_29 = arith.constant 5.000000e-01 : f32
    %42 = vector.broadcast %cst_29 : f32 to vector<8x128xf32>
    %43 = arith.mulf %42, %41 : vector<8x128xf32>
    %44 = math.tanh %43 : vector<8x128xf32>
    %cst_30 = arith.constant 1.000000e+00 : f32
    %45 = vector.broadcast %cst_30 : f32 to vector<8x128xf32>
    %46 = arith.mulf %45, %44 : vector<8x128xf32>
    %c0_31 = arith.constant 0 : index
    %c0_32 = arith.constant 0 : index
    %47 = vector.load %arg10[%c0_31, %c0_32] : memref<8x128xf32, #tpu.memory_space<vmem>>, vector<8x128xf32>
    tpu.vector_store %arg10[%c0_31, %c0_32], %46 {strides = array<i32>} : memref<8x128xf32, #tpu.memory_space<vmem>>, vector<8x128xf32>,
    return
  }
  func.func @transform_0(%arg0: i32) -> (i32, i32) {
    %c0_i32 = arith.constant 0 : i32
    %c0_i32_0 = arith.constant 0 : i32
    return %arg0, %c0_i32 : i32, i32
  }
  func.func @transform_1(%arg0: i32) -> (i32, i32) {
    %c0_i32 = arith.constant 0 : i32
    %c0_i32_0 = arith.constant 0 : i32
    return %arg0, %c0_i32 : i32, i32
  }
  func.func @transform_2(%arg0: i32) -> (i32, i32) {
    %c0_i32 = arith.constant 0 : i32
    %c0_i32_0 = arith.constant 0 : i32
    %c0_i32_1 = arith.constant 0 : i32
    return %c0_i32, %c0_i32_0 : i32, i32
  }
  func.func @transform_3(%arg0: i32) -> (i32, i32) {
    %c0_i32 = arith.constant 0 : i32
    %c0_i32_0 = arith.constant 0 : i32
    %c0_i32_1 = arith.constant 0 : i32
    return %c0_i32, %c0_i32_0 : i32, i32
  }
  func.func @transform_4(%arg0: i32) -> (i32, i32) {
    %c0_i32 = arith.constant 0 : i32
    %c0_i32_0 = arith.constant 0 : i32
    %c0_i32_1 = arith.constant 0 : i32
    return %c0_i32, %c0_i32_0 : i32, i32
  }
  func.func @transform_5(%arg0: i32) -> (i32, i32) {
    %c0_i32 = arith.constant 0 : i32
    %c0_i32_0 = arith.constant 0 : i32
    %c0_i32_1 = arith.constant 0 : i32
    return %c0_i32, %c0_i32_0 : i32, i32
  }
  func.func @transform_6(%arg0: i32) -> (i32, i32) {
    %c0_i32 = arith.constant 0 : i32
    %c0_i32_0 = arith.constant 0 : i32
    %c0_i32_1 = arith.constant 0 : i32
    return %c0_i32, %c0_i32_0 : i32, i32
  }
  func.func @transform_7(%arg0: i32) -> (i32, i32) {
    %c0_i32 = arith.constant 0 : i32
    %c0_i32_0 = arith.constant 0 : i32
    %c0_i32_1 = arith.constant 0 : i32
    return %c0_i32, %c0_i32_0 : i32, i32
  }
  func.func @transform_8(%arg0: i32) -> (i32, i32) {
    %c0_i32 = arith.constant 0 : i32
    %c0_i32_0 = arith.constant 0 : i32
    %c0_i32_1 = arith.constant 0 : i32
    return %c0_i32, %c0_i32_0 : i32, i32
  }
  func.func @transform_9(%arg0: i32) -> (i32, i32) {
    %c0_i32 = arith.constant 0 : i32
    %c0_i32_0 = arith.constant 0 : i32
    return %arg0, %c0_i32 : i32, i32
  }
}

</mosaic_0001>

<bundles_post_ra>
// kernel: tpu_custom_call.1
= control target key start
LH: loop header
LB: loop body
LE: loop exit
PB: predicated region body
PF: predicated region fallthrough
CT: control target
= control target key end

     0   :  { %14 = vsyncpa [#allocation3], 0  ;;  %s653_s0 = inlined_call_operand.hbm [shape: f32[8,16], index: 0, kind: input, shape index: {}]   ;;  %s654_s1 = inlined_call_operand.hbm [shape: f32[8,16], index: 1, kind: input, shape index: {}]   ;;  %s655_s2 = inlined_call_operand.hbm [shape: f32[16,32], index: 2, kind: input, shape index: {}]   ;;  %s656_s3 = inlined_call_operand.hbm [shape: f32[16,32], index: 3, kind: input, shape index: {}]   ;;  %s657_s4 = inlined_call_operand.vmem [shape: f32[1,32], index: 4, kind: input, shape index: {}]   ;;  %s658_s5 = inlined_call_operand.hbm [shape: f32[32,32], index: 5, kind: input, shape index: {}]   ;;  %s659_s6 = inlined_call_operand.vmem [shape: f32[1,32], index: 6, kind: input, shape index: {}]   ;;  %s660_s7 = inlined_call_operand.hbm [shape: f32[32,128], index: 7, kind: input, shape index: {}]   ;;  %s661_s8 = inlined_call_operand.vmem [shape: f32[1,128], index: 8, kind: input, shape index: {}]   ;;  %s662_s9 = inlined_call_operand.hbm [shape: f32[8,128], index: 9, kind: output, shape index: {}]  }
   0x1   :  { %15 = vsyncpa [#allocation6], 0 }
   0x2   :  { %16 = vsyncpa [#allocation9], 0 }
   0x3   :  { %17 = vsyncpa [#allocation12], 0  ;;  %s35_s11 = sshll.u32 %s654_s1, 4  ;;  %s36_s11 = int_to_ptr.hbm [resolvable:$true] %s35_s11 }
   0x4   :  { %18 = vsyncpa [#allocation4], 0  ;;  %s560_s12 = smov [#allocation5]   ;;  %s58_s16 = sshll.u32 %s656_s3, 4  ;;  %s59_s16 = int_to_ptr.hbm [resolvable:$true] %s58_s16 }
   0x5   :  { %s37_s13 = sshll.u32 %s560_s12, 4  ;;  %s561_s17 = smov [#allocation8]   ;;  %s38_s13 = int_to_ptr.vmem [resolvable:$true] %s37_s13 }
   0x6   :  { %40 = dma.hbm_to_vmem [thread:$0]  %s36_s11, 128, %s38_s13, [#allocation6]  }
   0x7   :  { %s60_s18 = sshll.u32 %s561_s17, 4  ;;  %s24_s21 = sshll.u32 %s653_s0, 4  ;;  %s61_s18 = int_to_ptr.vmem [resolvable:$true] %s60_s18  ;;  %s25_s21 = int_to_ptr.hbm [resolvable:$true] %s24_s21 }
   0x8   :  { %s562_s1 = smov 128   ;;  %s563_s22 = smov 8  }
   0x9   :  { %66 = dma.hbm_to_vmem [thread:$0]  %s59_s16, 256, %s61_s18, [#allocation9], %s562_s1, %s562_s1, %s563_s22  }
   0xa   :  { %s45_s25 = sshll.u32 %s655_s2, 4  ;;  %s564_s26 = smov [#allocation2]   ;;  %s46_s25 = int_to_ptr.hbm [resolvable:$true] %s45_s25 }
   0xb   :  { %s26_s27 = sshll.u32 %s564_s26, 4  ;;  %s565_s3 = smov [#allocation7]   ;;  %s27_s27 = int_to_ptr.vmem [resolvable:$true] %s26_s27 }
   0xc   :  { %29 = dma.hbm_to_vmem [thread:$0]  %s25_s21, 128, %s27_s27, [#allocation3]  }
   0xd   :  { %s47_s28 = sshll.u32 %s565_s3, 4  ;;  %s73_s0 = sshll.u32 %s658_s5, 4  ;;  %s48_s28 = int_to_ptr.vmem [resolvable:$true] %s47_s28  ;;  %s74_s0 = int_to_ptr.hbm [resolvable:$true] %s73_s0 }
   0xe   :  { %53 = dma.hbm_to_vmem [thread:$0]  %s46_s25, 256, %s48_s28, [#allocation6], %s562_s1, %s562_s1, %s563_s22  }
   0xf   :  { %s88_s12 = sshll.u32 %s660_s7, 4  ;;  %s566_s13 = smov [#allocation10]   ;;  %s89_s12 = int_to_ptr.hbm [resolvable:$true] %s88_s12 }
  0x10   :  { %s75_s2 = sshll.u32 %s566_s13, 4  ;;  %s567_s14 = smov [#allocation11]   ;;  %s76_s2 = int_to_ptr.vmem [resolvable:$true] %s75_s2 }
  0x11   :  { %81 = dma.hbm_to_vmem [thread:$0]  %s74_s0, 512, %s76_s2, [#allocation9], %s562_s1, %s562_s1, %s563_s22  }
  0x12   :  { %s90_s15 = sshll.u32 %s567_s14, 4  ;;  %s91_s15 = int_to_ptr.vmem [resolvable:$true] %s90_s15 }
  0x13   :  { %96 = dma.hbm_to_vmem [thread:$0]  %s89_s12, 512, %s91_s15, [#allocation12], %s562_s1, %s562_s1, %s563_s22  }
  0x14   :  { %550 = dma.done.wait [#allocation3], 128  }
  0x15   :  { %551 = vsyncadd [#allocation3], 4294967168 }
  0x16   :  { %552 = dma.done.wait [#allocation6], 384  }
  0x17   :  { %553 = vsyncadd [#allocation6], 4294966912 }
  0x18   :  { %554 = dma.done.wait [#allocation9], 768  }
  0x19   :  { %555 = vsyncadd [#allocation9], 4294966528 }
  0x1a   :  { %556 = dma.done.wait [#allocation12], 512  }
  0x1b   :  { %557 = vsyncadd [#allocation12], 4294966784  ;;  %v128_v0 = vld [vmem:[#allocation8 + $0x8] sm:$0xff]  ;;  %v126_v1 = vld [vmem:[#allocation7 + $0x8] sm:$0xff]  ;;  %vm130_vm0 = vcmask 130048   ;;  %vm232_vm1 = vcmask 261120  }
  0x1c   :  { %v127_v2 = vld [vmem:[#allocation8] sm:$0xff]  ;;  %195 = vmatpush.msra.mxu2 %v128_v0  ;;  %215 = vmatpush.msra.mxu3 %v126_v1  ;;  %v125_v3 = vld [vmem:[#allocation7] sm:$0xff]  ;;  %v124_v5 = vld [vmem:[#allocation5] sm:$0xff]  ;;  %s347_s1 = sshll.u32 %s662_s9, 4  ;;  %s348_s1 = int_to_ptr.hbm [resolvable:$true] %s347_s1 }
  0x1d   :  { %v123_v4 = vld [vmem:[#allocation2] sm:$0xff]  ;;  %148 = vmatpush.msra.mxu0 %v128_v0  ;;  %171 = vmatpush.msra.mxu1 %v126_v1  ;;  %v227_v6 = vld [vmem:[#allocation10 + $0x18] sm:$0xff]  ;;  %v225_v8 = vld [vmem:[#allocation10 + $0x8] sm:$0xff] }
  0x1e   :  { %196 = vmatpush.msra.mxu2 %v127_v2  ;;  %216 = vmatpush.msra.mxu3 %v125_v3  ;;  %v226_v7 = vld [vmem:[#allocation10 + $0x10] sm:$0xff]  ;;  %v224_v9 = vld [vmem:[#allocation10] sm:$0xff]  ;;  %v284_v10 = vld [vmem:[#allocation11 + $0x18] sm:$0xff] }
  0x1f   :  { %362 = vmatmul.msk.f32.vlgmr.msra.gmra.mxu2 %vm130_vm0, %v123_v4  ;;  %363 = vmatmul.msk.f32.vlgmr.msra.gmra.mxu3 %vm130_vm0, %v124_v5  ;;  %v283_v11 = vld [vmem:[#allocation11 + $0x10] sm:$0xff]  ;;  %v282_v23 = vld [vmem:[#allocation11 + $0x8] sm:$0xff]  ;;  %v281_v24 = vld [vmem:[#allocation11] sm:$0xff] }
  0x20   :  { %149 = vmatpush.msra.mxu0 %v127_v2  ;;  %172 = vmatpush.msra.mxu1 %v125_v3  ;;  %v377_v12 = vld [vmem:[%s657_s4] ss:$0 sm:$0xff] }
  0x21   :  { %360 = vmatmul.msk.f32.vlgmr.msra.gmra.mxu0 %vm130_vm0, %v124_v5  ;;  %361 = vmatmul.msk.f32.vlgmr.msra.gmra.mxu1 %vm130_vm0, %v123_v4  ;;  %v378_v25 = vld [vmem:[%s659_s6] ss:$0 sm:$0xff]  ;;  %s568_s6 = smov [#allocation13]  }
  0x22   :  { %248 = vmatpush.msrb.mxu0 %v227_v6  ;;  %272 = vmatpush.msrb.mxu1 %v227_v6  ;;  %v379_v32 = vld [vmem:[%s661_s8] ss:$0 sm:$0xff]  ;;  %s345_s19 = sshll.u32 %s568_s6, 4  ;;  %s346_s19 = int_to_ptr.vmem [resolvable:$true] %s345_s19 }
  0x23   :  { %304 = vmatpush.msrb.mxu2 %v284_v10  ;;  %327 = vmatpush.msrb.mxu3 %v284_v10 }
  0x24   :  { %249 = vmatpush.msrb.mxu0 %v226_v7  ;;  %273 = vmatpush.msrb.mxu1 %v226_v7 }
  0x25   :  { %305 = vmatpush.msrb.mxu2 %v283_v11  ;;  %328 = vmatpush.msrb.mxu3 %v283_v11 }
  0x26   :  { %250 = vmatpush.msrb.mxu0 %v225_v8  ;;  %274 = vmatpush.msrb.mxu1 %v225_v8 }
  0x27   :  { %306 = vmatpush.msrb.mxu2 %v282_v23  ;;  %329 = vmatpush.msrb.mxu3 %v282_v23 }
  0x28   :  { %251 = vmatpush.msrb.mxu0 %v224_v9  ;;  %275 = vmatpush.msrb.mxu1 %v224_v9 }
  0x29   :  { %307 = vmatpush.msrb.mxu2 %v281_v24  ;;  %330 = vmatpush.msrb.mxu3 %v281_v24 }
  0x9e   :  { %v151_v13 = vpop.f32.mrf.mxu0  ;;  %v174_v14 = vpop.f32.mrf.mxu1 }
  0x9f   :  { %v175_v15 = vadd.f32 %v174_v14, %v151_v13 }
  0xa1   :  { %v180_v16 = vadd.f32 %v377_v12, %v175_v15 }
  0xa2   :  { %v198_v17 = vpop.f32.mrf.mxu2  ;;  %v218_v18 = vpop.f32.mrf.mxu3 }
  0xa3   :  { %v222_v19 = vmax.f32 %v180_v16, 0.0  ;;  %v219_v20 = vadd.f32 %v218_v18, %v198_v17 }
  0xa5   :  { %v221_v21 = vadd.f32 %v377_v12, %v219_v20  ;;  %364 = vmatmul.msk.f32.vlgmr.msrb.gmra.mxu0 %vm232_vm1, %v222_v19 }
  0xa7   :  { %v223_v22 = vmax.f32 %v221_v21, 0.0 }
  0xa9   :  { %365 = vmatmul.msk.f32.vlgmr.msrb.gmra.mxu1 %vm232_vm1, %v223_v22 }
 0x122   :  { %v253_v26 = vpop.f32.mrf.mxu0 }
 0x123   :  { %v254_v27 = vadd.f32 %v378_v25, %v253_v26 }
 0x125   :  { %v256_v28 = vmax.f32 %v254_v27, 0.0 }
 0x126   :  { %v277_v29 = vpop.f32.mrf.mxu1 }
 0x127   :  { %v278_v30 = vadd.f32 %v378_v25, %v277_v29  ;;  %366 = vmatmul.msk.f32.vlgmr.msrb.gmra.mxu2 %vm232_vm1, %v256_v28 }
 0x129   :  { %v280_v31 = vmax.f32 %v278_v30, 0.0 }
 0x12b   :  { %367 = vmatmul.msk.f32.vlgmr.msrb.gmra.mxu3 %vm232_vm1, %v280_v31 }
 0x1aa   :  { %v309_v33 = vpop.f32.mrf.mxu2 }
 0x1ab   :  { %v310_v34 = vadd.f32 %v379_v32, %v309_v33 }
 0x1ae   :  { %v332_v35 = vpop.f32.mrf.mxu3 }
 0x1af   :  { %v333_v36 = vadd.f32 %v379_v32, %v332_v35 }
 0x1b1   :  { %v335_v37 = vadd.f32 %v333_v36, %v310_v34 }
 0x1b3   :  { %v336_v38 = vmul.f32 0.5, %v335_v37 }
 0x1b5   :  { %v337_v39 = vmul.f32 0.5, %v336_v38 }
 0x1b7   :  { %380 = vtanh.f32 %v337_v39 }
 0x1bd   :  { %v381_v40 = vpop.eup %380 }
 0x1be   :  { %339 = vst [vmem:[#allocation13] sm:$0xff] %v381_v40 }
 0x1bf   :  { %350 = dma.vmem_to_hbm [thread:$0]  %s346_s19, 128, %s348_s1, [#allocation4]  }
 0x1c0   :  { %558 = dma.done.wait [#allocation4], 128  }
 0x1c1   :  { %559 = vsyncadd [#allocation4], 4294967168 }
 0x1c2   :  { %355 = vsyncpa [#allocation3], 1 }
 0x1c3   :  { %356 = vsyncpa [#allocation6], 1 }
 0x1c4   :  { %357 = vsyncpa [#allocation9], 1 }
 0x1c5   :  { %358 = vsyncpa [#allocation12], 1 }
 0x1c6   :  { %359 = vsyncpa [#allocation4], 1 }

</bundles_post_ra>
